<compile_context>
chip_gen: v7x
topology: tpu7x:2x2x1
jax: 0.10.0
libtpu: 0.0.40
codegen_flags: <defaults>
</compile_context>

<pallas_src>
import jax
import jax.numpy as jnp
from jax.experimental import pallas as pl
from jax.experimental.pallas import tpu as pltpu

_VMEM_LIMIT_BYTES = 32 * 1024 * 1024  # safe on v5e/v6e/v7x; tiles sized well below


def _choose_tile_hw(HW: int, C: int, in_itemsize: int,
                    max_tile: int = 8192, budget_bytes: int = 12 * 1024 * 1024) -> int:
    """Largest multiple-of-128 tile that divides HW and fits the VMEM budget."""
    # double-buffered logits + int32 labels + f32 output, per lane element
    per_elem = 2 * (C * in_itemsize + 4 + 4)
    cap = max(128, min(max_tile, budget_bytes // per_elem))
    top = (min(cap, HW) // 128) * 128
    for t in range(top, 0, -128):
        if HW % t == 0:
            return t
    # HW has no multiple-of-128 divisor <= cap; fall back to one full-width
    # block (legal: block dim == full array dim), correctness preserved.
    return HW


def _pow_one_minus_p(p, gamma: float):
    """(1 - p) ** gamma, specialized at trace time to avoid pow -> log+exp."""
    g = float(gamma)
    q = 1.0 - p
    if g == 0.0:
        return jnp.ones_like(p)
    if g.is_integer() and 1.0 <= g <= 8.0:
        w = q
        for _ in range(int(g) - 1):
            w = w * q
        return w
    # General gamma: one log + one exp on the EUP. Clamp protects against tiny
    # negative (1 - p) from rounding.
    return jnp.exp(g * jnp.log(jnp.maximum(q, 0.0)))


def _make_focal_kernels(alpha: float, gamma: float, smooth_factor: float, num_classes: int):
    # label-smoothing epsilon, exactly as in the PyTorch code (guard C == 1)
    eps = (smooth_factor / (num_classes - 1)) if num_classes > 1 else 0.0

    def _tile_focal(t, x):
        # x: (C, T) f32 logits ; t: (1, T) int32 labels -> (C, T) contributions
        m = jnp.max(x, axis=0, keepdims=True)          # (1, T)
        z = x - m                                      # (C, T)
        e = jnp.exp(z)                                 # (C, T)
        s = jnp.sum(e, axis=0, keepdims=True)          # (1, T)
        inv_s = pl.reciprocal(s, approx=False)         # exact: loss needs 1e-4
        p = e * inv_s                                  # softmax
        logp = z - jnp.log(s)                          # log_softmax

        cls = jax.lax.broadcasted_iota(jnp.int32, x.shape, 0)   # (C, T)
        onehot = (cls == t).astype(jnp.float32)

        # Exact replication of the module's smoothing line.
        # NOTE: with smooth_factor == 0 this INVERTS the one-hot (selects the
        # non-target classes), matching the PyTorch module being mirrored.
        toh = onehot * eps + (1.0 - onehot) * (1.0 - eps)

        weight = _pow_one_minus_p(p, gamma)            # (1 - p)^gamma
        focal = (-alpha) * weight * logp               # -alpha * w * log p
        return toh * focal                             # (C, T)

    def kernel_none(t_ref, x_ref, o_ref):
        # blocks: t (1,1,T) int32, x (1,C,T), o (1,1,T) f32
        contrib = _tile_focal(t_ref[0], x_ref[0].astype(jnp.float32))
        # einsum 'bc...,bc...->b...' == sum over classes (sublane reduce)
        o_ref[0] = jnp.sum(contrib, axis=0, keepdims=True)   # (1, T)

    def kernel_reduce(t_ref, x_ref, o_ref):
        # o block (1,1,1) is resident across the 'arbitrary' spatial axis.
        @pl.when(pl.program_id(1) == 0)
        def _():
            o_ref[...] = jnp.zeros_like(o_ref)
        contrib = _tile_focal(t_ref[0], x_ref[0].astype(jnp.float32))
        row = jnp.sum(contrib, axis=0, keepdims=True)         # (1, T)
        tile_sum = jnp.sum(row, axis=1, keepdims=True)        # (1, 1)
        o_ref[0] = o_ref[0] + tile_sum

    return kernel_none, kernel_reduce


def focal_loss_pallas(preds, target, alpha: float, gamma: float = 2.0,
                      reduction: str = "none", smooth_factor: float = 0.0):
    """preds: (N, C, *spatial) logits; target: (N, *spatial) integer labels."""
    # TODO(synk): pre-one-hot floating-point targets (the target.is_floating_point()
    # branch of the PyTorch module) are not handled; integer class labels only.
    N, C = int(preds.shape[0]), int(preds.shape[1])
    spatial = tuple(int(d) for d in preds.shape[2:])
    HW = 1
    for d in spatial:
        HW *= d

    # Keep bf16/f32 logits in their native dtype (upcast happens in-kernel).
    x = preds.reshape(N, C, HW)
    if x.dtype != jnp.bfloat16 and x.dtype != jnp.float32:
        x = x.astype(jnp.float32)
    t = target.reshape(N, 1, HW).astype(jnp.int32)

    TILE = _choose_tile_hw(HW, C, x.dtype.itemsize)
    S = HW // TILE  # exact by construction

    kernel_none, kernel_reduce = _make_focal_kernels(
        float(alpha), float(gamma), float(smooth_factor), C)

    in_specs = [
        pl.BlockSpec((1, 1, TILE), lambda b, s: (b, 0, s)),   # labels
        pl.BlockSpec((1, C, TILE), lambda b, s: (b, 0, s)),   # logits
    ]

    if reduction == "none":
        out = pl.pallas_call(
            kernel_none,
            out_shape=jax.ShapeDtypeStruct((N, 1, HW), jnp.float32),
            grid_spec=pltpu.PrefetchScalarGridSpec(
                num_scalar_prefetch=0,
                grid=(N, S),
                in_specs=in_specs,
                out_specs=pl.BlockSpec((1, 1, TILE), lambda b, s: (b, 0, s)),
            ),
            compiler_params=pltpu.CompilerParams(
                dimension_semantics=("parallel", "parallel"),
                vmem_limit_bytes=_VMEM_LIMIT_BYTES,
            ),
        )(t, x)
        return out.reshape((N,) + spatial)

    elif reduction in ("mean", "sum"):
        # Fused reduction: per-batch scalar accumulated across the spatial axis.
        partial = pl.pallas_call(
            kernel_reduce,
            out_shape=jax.ShapeDtypeStruct((N, 1, 1), jnp.float32),
            grid_spec=pltpu.PrefetchScalarGridSpec(
                num_scalar_prefetch=0,
                grid=(N, S),
                in_specs=in_specs,
                out_specs=pl.BlockSpec((1, 1, 1), lambda b, s: (b, 0, 0)),
            ),
            compiler_params=pltpu.CompilerParams(
                dimension_semantics=("parallel", "arbitrary"),
                vmem_limit_bytes=_VMEM_LIMIT_BYTES,
            ),
        )(t, x)
        total = jnp.sum(partial)
        if reduction == "sum":
            return total
        return total / float(N * HW)

    else:
        raise NotImplementedError(f"Invalid reduction mode: {reduction}")


class FocalLoss:
    """JAX/Pallas mirror of the PyTorch FocalLoss module (forward only)."""

    def __init__(self, alpha: float, gamma: float = 2.0, reduction: str = "none",
                 eps=None, label_smoothing: float = 0.0):
        self.alpha = alpha
        self.gamma = gamma
        self.reduction = reduction
        self.eps = eps          # deprecated, unused (kept for signature parity)
        self.label_smooth = label_smoothing

    def __call__(self, preds, target):
        return focal_loss_pallas(preds, target, self.alpha, self.gamma,
                                 self.reduction, self.label_smooth)


def _focal_loss_ref(preds, target, alpha, gamma, smooth_factor):
    """Pure-JAX reference matching the PyTorch code path (reduction='none')."""
    C = preds.shape[1]
    preds = preds.astype(jnp.float32)
    p = jax.nn.softmax(preds, axis=1)
    logp = jax.nn.log_softmax(preds, axis=1)
    onehot = jax.nn.one_hot(target, C, axis=1, dtype=jnp.float32)
    eps = smooth_factor / (C - 1) if C > 1 else 0.0
    toh = onehot * eps + (1.0 - onehot) * (1.0 - eps)
    weight = jnp.power(1.0 - p, gamma)
    focal = -alpha * weight * logp
    return jnp.sum(toh * focal, axis=1)


if __name__ == "__main__":
    key = jax.random.PRNGKey(0)
    k1, k2 = jax.random.split(key)

    N, C, H, W = 2, 4, 16, 16
    preds = jax.random.normal(k1, (N, C, H, W), dtype=jnp.float32)
    target = jax.random.randint(k2, (N, H, W), 0, C, dtype=jnp.int32)

    alpha, gamma = 0.25, 2.0

    # reduction='none', no smoothing
    loss_fn = FocalLoss(alpha=alpha, gamma=gamma, reduction="none",
                        label_smoothing=0.0)
    loss = jax.block_until_ready(loss_fn(preds, target))
    ref = _focal_loss_ref(preds, target, alpha, gamma, 0.0)
    assert loss.shape == (N, H, W), loss.shape
    assert jnp.allclose(loss, ref, atol=1e-4, rtol=1e-4), \
        float(jnp.max(jnp.abs(loss - ref)))

    # reduction='none', with label smoothing
    loss_sm = jax.block_until_ready(
        FocalLoss(alpha, gamma, "none", label_smoothing=0.1)(preds, target))
    ref_sm = _focal_loss_ref(preds, target, alpha, gamma, 0.1)
    assert jnp.allclose(loss_sm, ref_sm, atol=1e-4, rtol=1e-4), \
        float(jnp.max(jnp.abs(loss_sm - ref_sm)))

    # fused 'sum' / 'mean' reductions
    loss_sum = jax.block_until_ready(
        FocalLoss(alpha, gamma, "sum", label_smoothing=0.0)(preds, target))
    loss_mean = jax.block_until_ready(
        FocalLoss(alpha, gamma, "mean", label_smoothing=0.0)(preds, target))
    assert jnp.allclose(loss_sum, jnp.sum(ref), rtol=1e-4, atol=1e-3), \
        (float(loss_sum), float(jnp.sum(ref)))
    assert jnp.allclose(loss_mean, jnp.mean(ref), rtol=1e-4, atol=1e-4), \
        (float(loss_mean), float(jnp.mean(ref)))

    # bf16 logits path (DMA bf16, upcast in-kernel)
    preds_bf16 = preds.astype(jnp.bfloat16)
    loss_bf16 = jax.block_until_ready(loss_fn(preds_bf16, target))
    ref_bf16 = _focal_loss_ref(preds_bf16, target, alpha, gamma, 0.0)
    assert loss_bf16.shape == (N, H, W)
    assert bool(jnp.all(jnp.isfinite(loss_bf16)))
    assert jnp.allclose(loss_bf16, ref_bf16, atol=1e-3, rtol=1e-3), \
        float(jnp.max(jnp.abs(loss_bf16 - ref_bf16)))

    print("KERNEL_OK")
</pallas_src>

<mosaic_0001>
module attributes {stable_mosaic.version = 11 : i64} {
  func.func @kernel_none(%arg0: i32, %arg1: i32, %arg2: memref<1x1x256xi32, #tpu.memory_space<vmem>>, %arg3: memref<1x4x256xf32, #tpu.memory_space<vmem>>, %arg4: memref<1x1x256xf32, #tpu.memory_space<vmem>>) attributes {dimension_semantics = [#tpu.dimension_semantics<parallel>, #tpu.dimension_semantics<parallel>], iteration_bounds = array<i64: 2, 1>, scalar_prefetch = 0 : i64, scratch_operands = 0 : i64, tpu.core_type = #tpu.core_type<tc>, window_params = [{transform_indices = @transform_0, window_bounds = array<i64: 1, 1, 256>}, {transform_indices = @transform_1, window_bounds = array<i64: 1, 4, 256>}, {transform_indices = @transform_2, window_bounds = array<i64: 1, 1, 256>}]} {
    %c0 = arith.constant 0 : index
    %c0_0 = arith.constant 0 : index
    %c0_1 = arith.constant 0 : index
    %0 = vector.load %arg2[%c0, %c0_0, %c0_1] : memref<1x1x256xi32, #tpu.memory_space<vmem>>, vector<1x1x256xi32>
    %1 = vector.shape_cast %0 : vector<1x1x256xi32> to vector<1x256xi32>
    %c0_2 = arith.constant 0 : index
    %c0_3 = arith.constant 0 : index
    %c0_4 = arith.constant 0 : index
    %2 = vector.load %arg3[%c0_2, %c0_3, %c0_4] : memref<1x4x256xf32, #tpu.memory_space<vmem>>, vector<1x4x256xf32>
    %3 = vector.shape_cast %2 : vector<1x4x256xf32> to vector<4x256xf32>
    %cst = arith.constant dense<0xFF800000> : vector<256xf32>
    %4 = vector.multi_reduction <maximumf>, %3, %cst [0] : vector<4x256xf32> to vector<256xf32>
    %5 = vector.shape_cast %4 : vector<256xf32> to vector<1x256xf32>
    %6 = vector.broadcast %5 : vector<1x256xf32> to vector<4x256xf32>
    %7 = arith.subf %3, %6 : vector<4x256xf32>
    %8 = math.exp %7 : vector<4x256xf32>
    %cst_5 = arith.constant dense<0.000000e+00> : vector<256xf32>
    %9 = vector.multi_reduction <add>, %8, %cst_5 [0] : vector<4x256xf32> to vector<256xf32>
    %10 = vector.shape_cast %9 : vector<256xf32> to vector<1x256xf32>
    %11 = tpu.reciprocal %10 : vector<1x256xf32> -> vector<1x256xf32>
    %12 = vector.broadcast %11 : vector<1x256xf32> to vector<4x256xf32>
    %13 = arith.mulf %8, %12 : vector<4x256xf32>
    %14 = math.log %10 : vector<1x256xf32>
    %15 = vector.broadcast %14 : vector<1x256xf32> to vector<4x256xf32>
    %16 = arith.subf %7, %15 : vector<4x256xf32>
    %17 = tpu.iota {dimensions = array<i32: 0>} : vector<4x256xi32>
    %18 = vector.broadcast %1 : vector<1x256xi32> to vector<4x256xi32>
    %19 = arith.cmpi eq, %17, %18 : vector<4x256xi32>
    %20 = arith.extui %19 : vector<4x256xi1> to vector<4x256xi32>
    %21 = arith.sitofp %20 : vector<4x256xi32> to vector<4x256xf32>
    %cst_6 = arith.constant 0.000000e+00 : f32
    %22 = vector.broadcast %cst_6 : f32 to vector<4x256xf32>
    %23 = arith.mulf %21, %22 : vector<4x256xf32>
    %cst_7 = arith.constant 1.000000e+00 : f32
    %24 = vector.broadcast %cst_7 : f32 to vector<4x256xf32>
    %25 = arith.subf %24, %21 : vector<4x256xf32>
    %cst_8 = arith.constant 1.000000e+00 : f32
    %26 = vector.broadcast %cst_8 : f32 to vector<4x256xf32>
    %27 = arith.mulf %25, %26 : vector<4x256xf32>
    %28 = arith.addf %23, %27 : vector<4x256xf32>
    %cst_9 = arith.constant 1.000000e+00 : f32
    %29 = vector.broadcast %cst_9 : f32 to vector<4x256xf32>
    %30 = arith.subf %29, %13 : vector<4x256xf32>
    %31 = arith.mulf %30, %30 : vector<4x256xf32>
    %cst_10 = arith.constant -2.500000e-01 : f32
    %32 = vector.broadcast %cst_10 : f32 to vector<4x256xf32>
    %33 = arith.mulf %32, %31 : vector<4x256xf32>
    %34 = arith.mulf %33, %16 : vector<4x256xf32>
    %35 = arith.mulf %28, %34 : vector<4x256xf32>
    %cst_11 = arith.constant dense<0.000000e+00> : vector<256xf32>
    %36 = vector.multi_reduction <add>, %35, %cst_11 [0] : vector<4x256xf32> to vector<256xf32>
    %37 = vector.shape_cast %36 : vector<256xf32> to vector<1x256xf32>
    %c0_12 = arith.constant 0 : index
    %c0_13 = arith.constant 0 : index
    %c0_14 = arith.constant 0 : index
    %38 = vector.load %arg4[%c0_12, %c0_13, %c0_14] : memref<1x1x256xf32, #tpu.memory_space<vmem>>, vector<1x1x256xf32>
    %39 = vector.shape_cast %38 : vector<1x1x256xf32> to vector<1x256xf32>
    %40 = vector.shape_cast %37 : vector<1x256xf32> to vector<1x1x256xf32>
    tpu.vector_store %arg4[%c0_12, %c0_13, %c0_14], %40 {strides = array<i32>} : memref<1x1x256xf32, #tpu.memory_space<vmem>>, vector<1x1x256xf32>,
    return
  }
  func.func @transform_0(%arg0: i32, %arg1: i32) -> (i32, i32, i32) {
    %c0_i32 = arith.constant 0 : i32
    %c0_i32_0 = arith.constant 0 : i32
    return %arg0, %c0_i32, %arg1 : i32, i32, i32
  }
  func.func @transform_1(%arg0: i32, %arg1: i32) -> (i32, i32, i32) {
    %c0_i32 = arith.constant 0 : i32
    %c0_i32_0 = arith.constant 0 : i32
    return %arg0, %c0_i32, %arg1 : i32, i32, i32
  }
  func.func @transform_2(%arg0: i32, %arg1: i32) -> (i32, i32, i32) {
    %c0_i32 = arith.constant 0 : i32
    %c0_i32_0 = arith.constant 0 : i32
    return %arg0, %c0_i32, %arg1 : i32, i32, i32
  }
}

</mosaic_0001>

<bundles_post_ra>
// kernel: tpu_custom_call.1
= control target key start
LH: loop header
LB: loop body
LE: loop exit
PB: predicated region body
PF: predicated region fallthrough
CT: control target
= control target key end

     0   :  { %7 = vsyncpa [#allocation3], 0  ;;  %s980_s0 = inlined_call_operand.hbm [shape: s32[2,1,256], index: 0, kind: input, shape index: {}]   ;;  %s981_s1 = inlined_call_operand.hbm [shape: f32[2,4,256], index: 1, kind: input, shape index: {}]   ;;  %s982_s2 = inlined_call_operand.hbm [shape: f32[2,1,256], index: 2, kind: output, shape index: {}]  }
   0x1   :  { %9 = vsyncpa [#allocation3 + $0x1], 0 }
   0x2   :  { %10 = vsyncpa [#allocation6], 0 }
   0x3   :  { %12 = vsyncpa [#allocation6 + $0x1], 0 }
   0x4   :  { %13 = vsyncpa [#allocation4], 0 }
   0x5   :  { %15 = vsyncpa [#allocation4 + $0x1], 0  ;;  %s750_s9 = smov 0   ;;  %s752_s10 = smov 0  }
   0x6   :  { %s754_s11 = smov 0   ;;  %s756_s12 = smov 0  }
   0x7   :  { %s758_s13 = smov 0   ;;  %s760_s14 = smov 0  }
   0x8 LB: > { %s478_s15 = sadd.s32 4294967295, %s728_s14   ;;  %s479_s16 = sadd.s32 4294967294, %s728_s14   ;;  %s728_s14 = sphi %s760_s14, %s21_s14   ;;  %s724_s13 = sphi %s758_s13, %s1002_s13   ;;  %s720_s12 = sphi %s756_s12, %s1001_s12   ;;  %s716_s11 = sphi %s754_s11, %s1000_s11   ;;  %s712_s10 = sphi %s752_s10, %s999_s10   ;;  %s708_s9 = sphi %s750_s9, %s998_s9  }
   0x9   : > { %s33_s17 = sadd.s32 1, %s724_s13  ;;  %s42_s18 = sadd.s32 1, %s716_s11 }
   0xa   : > { %p35_p0 = scmp.ge.s32.totalorder %s33_s17, 2  ;;  %p49_p1 = scmp.ne.s32.totalorder %s716_s11, %s712_s10 }
   0xb   : > { %p50_p2 = scmp.eq.s32.totalorder %s728_s14, 0  ;;  %p55_p3 = scmp.ne.s32.totalorder %s712_s10, %s708_s9 }
   0xc   : > { %s1004_s17 = smov (%p35_p0, %s33_s17), 0  ;;  %p56_p5 = scmp.eq.s32.totalorder %s478_s15, 0 }
   0xd   : > { %p791_p4 = por %p50_p2, %p49_p1  ;;  %s37_s20 = ssub.s32 %s724_s13, %s1004_s17 }
   0xe   : > { %p109_p6 = scmp.eq.s32.totalorder %s478_s15, 1  ;;  %p40_p7 = scmp.eq.s32.totalorder %s37_s20, 0 }
   0xf   : > { %p797_p8 = por %p56_p5, %p55_p3  ;;  %p115_p10 = scmp.eq.s32.totalorder %s479_s16, 1 }
  0x10   : > { %p801_p9 = por %p109_p6, %p49_p1  ;;  %p519_p13 = scmp.lt.s32.totalorder %s728_s14, 2 }
  0x11   : > { %s986_s21 = scalar_select %p797_p8, 1, 0 }
  0x12   : > { %s987_s22 = scalar_select %p801_p9, 1, 0 }
  0x13   : > { %s806_s23 = scalar_select %p40_p7, %s716_s11, %s42_s18  }
  0x14   : > { %p808_p11 = por %p115_p10, %p55_p3  ;;  %s815_s25 = sand.u32 1, %s716_s11  }
  0x15   : > { %s482_s26 = sshll.u32 %s815_s25, 1  ;;  %s499_s27 = sshll.u32 %s724_s13, 5 }
  0x16   : > { %s988_s24 = scalar_select %p808_p11, 1, 0 }
  0x17   : > { %s822_s30 = scalar_lea.hbm %s980_s0, %s499_s27  ;;  %s139_s3 = scalar_lea.vmem [#allocation2], %s482_s26 }
  0x18   : > { %s149_s4 = sshll.u32 %s139_s3, 4  ;;  %p828_p0 = pnand %p519_p13, %p791_p4  ;;  %s824_s4 = int_to_ptr.vmem [resolvable:$true] %s149_s4 }
  0x19   : > { %s136_s6 = scalar_lea.sflag [#allocation3], %s815_s25  ;;  %s582_s7 = scalar_lea.hbm %s822_s30, 32 }
  0x1a   : > { %p583_p3 = scmp.ne.s32.totalorder %s822_s30, %s582_s7  ;;  %p584_p5 = pneg %p828_p0 }
  0x1b   : > { %s587_s16 = scalar_lea.hbm %s980_s0, 64  ;;  %p588_p4 = scmp.lt.u32.totalorder %s822_s30, %s980_s0 }
  0x1c   : > { %p585_p6 = pnand %p584_p5, %p583_p3  ;;  %p589_p10 = scmp.lt.u32.totalorder %s587_s16, %s582_s7 }
  0x1d   : > { %p591_p12 = scmp.lt.u32.totalorder %s582_s7, %s822_s30 }
  0x1e   : > { %p586_p7 = pneg %p585_p6  ;;  %p590_p13 = por %p589_p10, %p588_p4 }
  0x20   : > { %p592_p1 = por %p591_p12, %p590_p13 }
  0x22   : > { %p593_p2 = pnand %p592_p1, %p586_p7 }
  0x24   : > { %596 = shalt.err (!%p593_p2)
}
  0x25   : > { %s597_s20 = scalar_lea.vmem %s824_s4, 32  ;;  %s730_s26 = smov [#allocation2]  }
  0x26   : > { %p598_p3 = scmp.ne.s32.totalorder %s824_s4, %s597_s20  ;;  %s602_s27 = sshll.u32 %s730_s26, 4  ;;  %s603_s27 = int_to_ptr.vmem [resolvable:$false] %s602_s27 }
  0x27   : > { %s604_s28 = scalar_lea.vmem %s603_s27, 64  ;;  %p605_p9 = scmp.lt.s32.totalorder %s824_s4, %s603_s27 }
  0x28   : > { %p600_p6 = pnand %p598_p3, %p584_p5  ;;  %p606_p4 = scmp.lt.s32.totalorder %s604_s28, %s597_s20 }
  0x2a   : > { %p601_p11 = pneg %p600_p6  ;;  %p607_p10 = por %p606_p4, %p605_p9 }
  0x2c   : > { %p608_p12 = pnand %p607_p10, %p601_p11 }
  0x2e   : > { %611 = shalt.err (!%p608_p12)
}
  0x2f   : > { %511 = dma.hbm_to_vmem [thread:$0]  (!%p828_p0), %s822_s30, 32, %s824_s4, %s136_s6  }
  0x30   : > { %p990_p1 = scmp.lt.s32.totalorder %s728_s14, 3  ;;  %p991_p2 = scmp.ge.s32.totalorder %s728_s14, 1 }
  0x31   : > { %s485_s3 = sshll.u32 %s815_s25, 3  ;;  %s500_s7 = sshll.u32 %s724_s13, 7 }
  0x32   : > { %p864_p7 = pnand %p991_p2, %p990_p1  ;;  %s873_s16 = scalar_lea.hbm %s981_s1, %s500_s7 }
  0x33   : > { %s160_s18 = scalar_lea.vmem [#allocation5], %s485_s3  ;;  %s157_s30 = scalar_lea.sflag [#allocation6], %s815_s25 }
  0x34   : > { %s992_s29 = scalar_select %p864_p7, 1, 0 }
  0x35   : > { %s170_s19 = sshll.u32 %s160_s18, 4  ;;  %s612_s4 = scalar_lea.hbm %s873_s16, 128  ;;  %s171_s19 = int_to_ptr.vmem [resolvable:$true] %s170_s19 }
  0x36   : > { %p613_p9 = scmp.ne.s32.totalorder %s873_s16, %s612_s4  ;;  %s617_s26 = scalar_lea.hbm %s981_s1, 256 }
  0x37   : > { %p618_p3 = scmp.lt.u32.totalorder %s873_s16, %s981_s1  ;;  %p619_p6 = scmp.lt.u32.totalorder %s617_s26, %s612_s4 }
  0x38   : > { %p615_p11 = pnand %p613_p9, %p584_p5  ;;  %p621_p10 = scmp.lt.u32.totalorder %s612_s4, %s873_s16 }
  0x39   : > { %p620_p4 = por %p619_p6, %p618_p3 }
  0x3a   : > { %p616_p13 = pneg %p615_p11 }
  0x3b   : > { %p622_p12 = por %p621_p10, %p620_p4 }
  0x3d   : > { %p623_p1 = pnand %p622_p12, %p616_p13 }
  0x3f   : > { %626 = shalt.err (!%p623_p1)
}
  0x40   : > { %s627_s25 = scalar_lea.vmem %s171_s19, 128  ;;  %s731_s3 = smov [#allocation5]  }
  0x41   : > { %p628_p2 = scmp.ne.s32.totalorder %s171_s19, %s627_s25  ;;  %s632_s7 = sshll.u32 %s731_s3, 4  ;;  %s633_s7 = int_to_ptr.vmem [resolvable:$false] %s632_s7 }
  0x42   : > { %s634_s8 = scalar_lea.vmem %s633_s7, 256  ;;  %p635_p8 = scmp.lt.s32.totalorder %s171_s19, %s633_s7 }
  0x43   : > { %p630_p9 = pnand %p628_p2, %p584_p5  ;;  %p636_p7 = scmp.lt.s32.totalorder %s634_s8, %s627_s25 }
  0x45   : > { %p631_p11 = pneg %p630_p9  ;;  %p637_p3 = por %p636_p7, %p635_p8 }
  0x47   : > { %p638_p6 = pnand %p637_p3, %p631_p11 }
  0x49   : > { %641 = shalt.err (!%p638_p6)
}
  0x4a   : > { %514 = dma.hbm_to_vmem [thread:$0]  (!%p828_p0), %s873_s16, 128, %s171_s19, %s157_s30  }
  0x4b   : > { %p993_p13 = scmp.ne.s32.totalorder %s992_s29, 0 }
  0x4c   : > { %s898_s15 = sand.u32 (!%p993_p13), 1, %s712_s10   ;;  %p994_p8 = scmp.ne.s32.totalorder (!%p993_p13), %s986_s21, 0 }
  0x4d   : > { %179 = sbr.rel (%p993_p13) target bundleno = 196 (0xc4), region = 28  ;;  %s489_s18 = sshll.u32 (!%p993_p13), %s898_s15, 1 }
  0x4e   : > { %s182_s4 = scalar_lea.sflag (!%p993_p13), [#allocation3], %s898_s15  ;;  %s904_s6 = scalar_lea.vmem (!%p993_p13), [#allocation2], %s489_s18 }
  0x54   : > { %695 = dma.done.wait (%p994_p8), %s182_s4, 32  }
  0x55   : > { %697 = vsyncadd (%p994_p8), %s182_s4, 4294967264  ;;  %s490_s5 = sshll.u32 %s898_s15, 3  ;;  %s191_s29 = scalar_lea.sflag [#allocation6], %s898_s15 }
  0x56   : > { %s194_s16 = scalar_lea.vmem [#allocation5], %s490_s5 }
  0x57   : > { %699 = dma.done.wait (%p994_p8), %s191_s29, 128  }
  0x58   : > { %701 = vsyncadd (%p994_p8), %s191_s29, 4294967168  ;;  %vm228_vm0 = vcmask 1043456   ;;  %v224_v0 = vld [vmem:[%s194_s16] sm:$0xff]  ;;  %v283_v30 = vlaneseq  ;;  %v223_v38 = vld [vmem:[%s904_s6] sm:$0x3]  ;;  %v732_v49 = vmov 0.0  }
  0x59   : > { %v226_v1 = vcombine.high %v224_v0, %v224_v0  ;;  %v229_v2 = vsel %vm228_vm0, %v224_v0, -inf  ;;  %s219_s21 = scalar_lea.vmem [#allocation7], %s489_s18  ;;  %s501_s30 = sshll.u32 %s720_s12, 5 }
  0x5a   : > { %v230_v3 = vrot.slane %v229_v2, 4  ;;  %v284_v35 = vshrl.u32 %v283_v30, 7  ;;  %s368_s19 = sshll.u32 %s219_s21, 4  ;;  %vm348_vm3 = vcmp.lt.s32.totalorder %v283_v30, 256  ;;  %s933_s27 = scalar_lea.hbm %s982_s2, %s501_s30  ;;  %s928_s19 = int_to_ptr.vmem [resolvable:$true] %s368_s19 }
  0x5b   : > { %v236_v4 = vsel %vm228_vm0, %v226_v1, -inf  ;;  %s352_s28 = scalar_lea.sflag [#allocation4], %s898_s15  ;;  %s642_s25 = scalar_lea.vmem %s928_s19, 32 }
  0x5c   : > { %v231_v5 = vmax.f32 %v229_v2, %v230_v3  ;;  %v237_v6 = vrot.slane %v236_v4, 4  ;;  %v287_v37 = vsub.s32 0, %v284_v35  ;;  %v291_v39 = vsub.s32 1, %v284_v35  ;;  %p643_p0 = scmp.ne.s32.totalorder %s928_s19, %s642_s25  ;;  %p995_p5 = scmp.ne.s32.totalorder %s987_s22, 0 }
  0x5d   : > { %s734_s12 = smov [#allocation7]  }
  0x5e   : > { %v232_v7 = vrot.slane %v231_v5, 2  ;;  %v238_v8 = vmax.f32 %v236_v4, %v237_v6  ;;  %v288_v40 = vrot.slane %v223_v38, %v287_v37  ;;  %v292_v41 = vrot.slane %v223_v38, %v291_v39  ;;  %p644_p7 = pnand %p643_p0, %p995_p5  ;;  %s646_s3 = sshll.u32 %s734_s12, 4  ;;  %s647_s3 = int_to_ptr.vmem [resolvable:$false] %s646_s3 }
  0x5f   : > { %s648_s7 = scalar_lea.vmem %s647_s3, 64  ;;  %p649_p10 = scmp.lt.s32.totalorder %s928_s19, %s647_s3 }
  0x60   : > { %v233_v9 = vmax.f32 %v231_v5, %v232_v7  ;;  %v239_v10 = vrot.slane %v238_v8, 2  ;;  %vm293_vm1 = vcmp.eq.s32.totalorder %v284_v35, %v288_v40  ;;  %vm294_vm2 = vcmp.eq.s32.totalorder %v284_v35, %v292_v41  ;;  %p645_p4 = pneg %p644_p7  ;;  %p650_p12 = scmp.lt.s32.totalorder %s648_s7, %s642_s25 }
  0x61   : > { %v492_v50 = vsel %vm293_vm1, 1.0, %v732_v49  ;;  %v493_v53 = vsel %vm294_vm2, 1.0, %v732_v49 }
  0x62   : > { %v234_v11 = vrot.slane %v233_v9, 1  ;;  %v240_v12 = vmax.f32 %v238_v8, %v239_v10  ;;  %v299_v54 = vmul.f32 0.0, %v492_v50  ;;  %v301_v55 = vsub.f32 1.0, %v492_v50  ;;  %p651_p1 = por %p650_p12, %p649_p10 }
  0x63   : > { %v300_v58 = vmul.f32 0.0, %v493_v53  ;;  %v302_v59 = vsub.f32 1.0, %v493_v53 }
  0x64   : > { %v235_v13 = vmax.f32 %v233_v9, %v234_v11  ;;  %v241_v14 = vrot.slane %v240_v12, 1  ;;  %v303_v61 = vadd.f32 %v301_v55, %v299_v54  ;;  %v733_v11 = vmov 1966171168   ;;  %p652_p2 = pnand %p651_p1, %p645_p4 }
  0x65   : > { %v304_v63 = vadd.f32 %v302_v59, %v300_v58 }
  0x66   : > { %v242_v15 = vmax.f32 %v240_v12, %v241_v14  ;;  %v332_v12 = vunpack.c.l.s4 %v733_v11 }
  0x68   : > { %v245_v16 = vcombine.low %v235_v13, %v242_v15 }
  0x6a   : > { %v247_v17 = vsub.f32 %v224_v0, %v245_v16 }
  0x6c   : > { %v248_v18 = vmul.f32 1.442695, %v247_v17 }
  0x6e   : > { %572 = vpow2.f32 %v248_v18 }
  0x78   : > { %v573_v19 = vpop.eup %572 }
  0x79   : > { %v251_v20 = vcombine.high %v573_v19, %v573_v19  ;;  %v253_v21 = vsel %vm228_vm0, %v573_v19, 0.0 }
  0x7a   : > { %v254_v22 = vrot.slane %v253_v21, 4 }
  0x7b   : > { %v260_v23 = vsel %vm228_vm0, %v251_v20, 0.0 }
  0x7c   : > { %v255_v24 = vadd.f32 %v254_v22, %v253_v21  ;;  %v261_v25 = vrot.slane %v260_v23, 4 }
  0x7e   : > { %v256_v26 = vrot.slane %v255_v24, 2  ;;  %v262_v27 = vadd.f32 %v261_v25, %v260_v23 }
  0x80   : > { %v257_v28 = vadd.f32 %v256_v26, %v255_v24  ;;  %v263_v29 = vrot.slane %v262_v27, 2 }
  0x82   : > { %v258_v31 = vrot.slane %v257_v28, 1  ;;  %v264_v32 = vadd.f32 %v263_v29, %v262_v27 }
  0x84   : > { %v259_v33 = vadd.f32 %v258_v31, %v257_v28  ;;  %v265_v34 = vrot.slane %v264_v32, 1 }
  0x86   : > { %v266_v36 = vadd.f32 %v265_v34, %v264_v32  ;;  %574 = vrcp.f32 %v259_v33 }
  0x87   : > { %576 = vlog2.f32 %v259_v33 }
  0x88   : > { %578 = vrcp.f32 %v266_v36 }
  0x89   : > { %580 = vlog2.f32 %v266_v36 }
  0x90   : > { %v575_v42 = vpop.eup %574 }
  0x91   : > { %v577_v43 = vpop.eup %576 }
  0x92   : > { %v579_v44 = vpop.eup %578  ;;  %v275_v45 = vmul.f32 0.6931472, %v577_v43 }
  0x93   : > { %v581_v46 = vpop.eup %580  ;;  %v271_v47 = vcombine.low %v575_v42, %v579_v44 }
  0x94   : > { %v277_v48 = vmul.f32 0.6931472, %v581_v46 }
  0x95   : > { %v273_v51 = vmul.f32 %v573_v19, %v271_v47 }
  0x96   : > { %v280_v52 = vcombine.low %v275_v45, %v277_v48 }
  0x97   : > { %v305_v56 = vsub.f32 1.0, %v273_v51 }
  0x98   : > { %v282_v57 = vsub.f32 %v247_v17, %v280_v52  ;;  %v333_v17 = vunpack.c.0.s8 %v332_v12 }
  0x99   : > { %v306_v60 = vmul.f32 %v305_v56, %v305_v56 }
  0x9a   : > { %v336_v21 = vsub.s32 %v333_v17, %v284_v35 }
  0x9b   : > { %v307_v62 = vmul.f32 -0.25, %v306_v60 }
  0x9d   : > { %v308_v0 = vmul.f32 %v307_v62, %v282_v57 }
  0x9f   : > { %v310_v1 = vcombine.high %v308_v0, %v308_v0  ;;  %v312_v2 = vmul.f32 %v308_v0, %v303_v61 }
  0xa1   : > { %v313_v3 = vmul.f32 %v310_v1, %v304_v63  ;;  %v314_v4 = vsel %vm228_vm0, %v312_v2, 0.0 }
  0xa2   : > { %v315_v5 = vrot.slane %v314_v4, 4 }
  0xa3   : > { %v321_v6 = vsel %vm228_vm0, %v313_v3, 0.0 }
  0xa4   : > { %v316_v7 = vadd.f32 %v315_v5, %v314_v4  ;;  %v322_v8 = vrot.slane %v321_v6, 4 }
  0xa6   : > { %v317_v9 = vrot.slane %v316_v7, 2  ;;  %v323_v10 = vadd.f32 %v322_v8, %v321_v6 }
  0xa8   : > { %v318_v13 = vadd.f32 %v317_v9, %v316_v7  ;;  %v324_v14 = vrot.slane %v323_v10, 2 }
  0xaa   : > { %v319_v15 = vrot.slane %v318_v13, 1  ;;  %v325_v16 = vadd.f32 %v324_v14, %v323_v10 }
  0xac   : > { %v320_v18 = vadd.f32 %v319_v15, %v318_v13  ;;  %v326_v19 = vrot.slane %v325_v16, 1 }
  0xae   : > { %v327_v20 = vadd.f32 %v326_v19, %v325_v16 }
  0xb0   : > { %v330_v22 = vcombine.low %v320_v18, %v327_v20 }
  0xb2   : > { %v337_v23 = vrot.slane %v330_v22, %v336_v21 }
  0xb4   : > { %v344_v24 = vrot.slane %v337_v23, %v336_v21 }
  0xb6   : > { %350 = vst.msk [vmem:[%s219_s21] sm:$0x3] %vm348_vm3, %v344_v24 }
  0xb7   : > { %655 = shalt.err (!%p652_p2)
}
  0xb8   : > { %s656_s8 = scalar_lea.hbm %s933_s27, 32  ;;  %s660_s4 = scalar_lea.hbm %s982_s2, 64 }
  0xb9   : > { %p657_p9 = scmp.ne.s32.totalorder %s933_s27, %s656_s8  ;;  %p661_p6 = scmp.lt.u32.totalorder %s933_s27, %s982_s2 }
  0xba   : > { %p662_p13 = scmp.lt.u32.totalorder %s660_s4, %s656_s8  ;;  %p664_p0 = scmp.lt.u32.totalorder %s656_s8, %s933_s27 }
  0xbb   : > { %p658_p11 = pnand %p657_p9, %p995_p5 }
  0xbc   : > { %p663_p8 = por %p662_p13, %p661_p6 }
  0xbd   : > { %p659_p3 = pneg %p658_p11 }
  0xbe   : > { %p665_p7 = por %p664_p0, %p663_p8 }
  0xc0   : > { %p666_p4 = pnand %p665_p7, %p659_p3 }
  0xc2   : > { %669 = shalt.err (!%p666_p4)
}
  0xc3   : > { %506 = dma.vmem_to_hbm [thread:$0]  (%p995_p5), %s928_s19, 32, %s933_s27, %s352_s28  }
  0xc4 PF: > { %s380_s29 = sand.u32 1, %s708_s9   ;;  %p996_p10 = scmp.ne.s32.totalorder %s988_s24, 0 }
  0xc5   : > { %p997_p12 = scmp.ge.s32.totalorder %s728_s14, 2  ;;  %s381_s16 = scalar_lea.sflag [#allocation4], %s380_s29 }
  0xc7   : > { %p516_p1 = pnand %p997_p12, %p996_p10 }
  0xc9   : > { %703 = dma.done.wait (!%p516_p1), %s381_s16, 32  }
  0xca   : > { %705 = vsyncadd (!%p516_p1), %s381_s16, 4294967264  ;;  %s21_s14 = sadd.s32 1, %s728_s14   ;;  %s998_s9 = smov %s712_s10 }
  0xcb   : > { %p18_p2 = scmp.ge.s32.totalorder %s21_s14, 4   ;;  %s999_s10 = smov %s716_s11 }
  0xcc   : > { %s1000_s11 = smov %s806_s23  ;;  %s1001_s12 = smov %s724_s13 }
  0xcd   : > { %s1002_s13 = smov %s1004_s17  ;;  %20 = sbr.rel (!%p18_p2) target bundleno = 8 (0x8), region = 86 }
  0xd4   :  { %386 = vsyncpa [#allocation3], 1 }
  0xd5   :  { %388 = vsyncpa [#allocation3 + $0x1], 1 }
  0xd6   :  { %389 = vsyncpa [#allocation6], 1 }
  0xd7   :  { %391 = vsyncpa [#allocation6 + $0x1], 1 }
  0xd8   :  { %392 = vsyncpa [#allocation4], 1 }
  0xd9   :  { %394 = vsyncpa [#allocation4 + $0x1], 1 }

</bundles_post_ra>
